<compile_context>
chip_gen: v5e
topology: v5e:2x2
jax: 0.10.0
libtpu: 0.0.40
codegen_flags: <defaults>
</compile_context>

<pallas_src>
import jax
import jax.numpy as jnp
from jax import lax
from jax.experimental import pallas as pl
from jax.experimental.pallas import tpu as pltpu

_LANE = 128                        # TPU lane width; batch tiles are multiples of this
_MAX_BLOCKS_PER_TILE = 128         # cap: 128 * 128 = 16384 rows per grid step
_VMEM_LIMIT_BYTES = 48 * 1024 * 1024  # > v5e (16 MiB) / v6e (32 MiB) defaults, < v7x 64 MiB phys

# "NT" contraction: (O, K) x (N, K) -> (O, N). Folds the x-tile transpose into the MXU feed
# (same structure as flash-attention's 'qd,kd->qk'), keeping the batch on the 128-lane axis.
_NT_DIMS = (((1,), (1,)), ((), ()))


def _make_mlp_kernel(has_g: bool, use_bf16: bool):
    cast = (lambda v: v.astype(jnp.bfloat16)) if use_bf16 else (lambda v: v)

    def kernel(*refs):
        if has_g:
            (x_ref, g_ref, w1x_ref, w1g_ref, b1_ref,
             w2_ref, b2_ref, w3_ref, b3_ref, ot_ref) = refs
        else:
            (x_ref, w1x_ref, b1_ref,
             w2_ref, b2_ref, w3_ref, b3_ref, ot_ref) = refs

        # ---- layer 1: h (H, bt) = W1x . x_tile^T [+ W1g . g_tile^T] + b1, ReLU -------
        # x arrives in its natural (batch_tile, Dx) layout; contracting both minor dims
        # gives the transposed, lane-dense result without an explicit transpose op.
        h = lax.dot_general(cast(w1x_ref[...]), cast(x_ref[...]),
                            dimension_numbers=_NT_DIMS,
                            preferred_element_type=jnp.float32)
        if has_g:
            h = h + lax.dot_general(cast(w1g_ref[...]), cast(g_ref[...]),
                                    dimension_numbers=_NT_DIMS,
                                    preferred_element_type=jnp.float32)
        h = jnp.maximum(h + b1_ref[...], 0.0)          # bias (H,1) broadcasts over lanes

        # ---- layer 2: Linear + ReLU (lane-dense (H, bt) f32 activations) -------------
        h = jnp.dot(cast(w2_ref[...]), cast(h), preferred_element_type=jnp.float32)
        h = jnp.maximum(h + b2_ref[...], 0.0)

        # ---- layer 3: Linear (no activation) ------------------------------------------
        out = jnp.dot(cast(w3_ref[...]), cast(h), preferred_element_type=jnp.float32)
        out = out + b3_ref[...]
        ot_ref[...] = out.astype(ot_ref.dtype)         # lane-dense (D_out, bt) store

    return kernel


def _pick_batch_tile(B: int) -> int:
    """Large lane-aligned tile (<= 16384 rows) giving an EVEN number of grid steps
    (v7x shards the 'parallel' axis across its 2 TensorCores)."""
    n_blocks = pl.cdiv(B, _LANE)
    steps = max(1, 2 * pl.cdiv(n_blocks, 2 * _MAX_BLOCKS_PER_TILE))
    blocks_per_tile = pl.cdiv(n_blocks, steps)
    return blocks_per_tile * _LANE


def mlp_forward(params, x, g=None, *, batch_tile=None, use_bf16_matmul=True):
    """Pallas implementation of MLP.forward (big=False).

    params: (w1, b1, w2, b2, w3, b3) with w_i [in, out] and b_i [1, out]
            (same math as torch nn.Linear with weight = w_i.T).
    x: (B, Dx); g: optional (B, Dg). Instead of materializing torch.cat([x, g], -1),
    g is a separate kernel input and W1 is split into W1x / W1g (weight-side only).
    """
    w1, b1, w2, b2, w3, b3 = params
    B, Dx = x.shape
    D_in, H = w1.shape
    D_out = w3.shape[1]

    has_g = g is not None
    if has_g:
        Dg = g.shape[-1]
        assert Dx + Dg == D_in, "x/g feature dims must sum to W1's input size"
        w1x, w1g = w1[:Dx], w1[Dx:]          # tiny weight split; no HBM pass over x
    else:
        assert Dx == D_in
        w1x, w1g = w1, None

    if batch_tile is None:
        batch_tile = _pick_batch_tile(B)
    assert batch_tile % _LANE == 0, "batch_tile must be a multiple of 128 (lane width)"
    grid = (pl.cdiv(B, batch_tile),)         # ragged last block: OOB reads padded, writes masked

    resident = lambda shape: pl.BlockSpec(shape, lambda i: (0, 0))   # VMEM-resident, no re-DMA

    in_specs = [pl.BlockSpec((batch_tile, Dx), lambda i: (i, 0))]    # x in natural layout
    operands = [x]
    if has_g:
        in_specs.append(pl.BlockSpec((batch_tile, Dg), lambda i: (i, 0)))
        operands.append(g)
        in_specs += [resident((H, Dx)), resident((H, Dg))]
        operands += [w1x.T, w1g.T]
    else:
        in_specs += [resident((H, Dx))]
        operands += [w1x.T]
    in_specs += [resident((H, 1)),
                 resident((H, H)), resident((H, 1)),
                 resident((D_out, H)), resident((D_out, 1))]
    operands += [b1.T, w2.T, b2.T, w3.T, b3.T]

    ot = pl.pallas_call(
        _make_mlp_kernel(has_g, use_bf16_matmul),
        out_shape=jax.ShapeDtypeStruct((D_out, B), x.dtype),
        grid_spec=pltpu.PrefetchScalarGridSpec(
            num_scalar_prefetch=0,
            grid=grid,
            in_specs=in_specs,
            out_specs=pl.BlockSpec((D_out, batch_tile), lambda i: (0, i)),  # lane-dense store
        ),
        compiler_params=pltpu.CompilerParams(
            dimension_semantics=("parallel",),       # independent batch tiles -> megacore
            vmem_limit_bytes=_VMEM_LIMIT_BYTES,
        ),
    )(*operands)

    # Only remaining wrapper layout op: (D_out, B) -> (B, D_out); D_out is tiny (8), so
    # this is <= half the bytes of x and typically fuses into the consumer.
    return jnp.transpose(ot)


def init_mlp_params(key, input_size, output_size, hidden=32, dtype=jnp.float32):
    """Deterministic synthetic parameters (same shapes as nn.Linear layers, big=False)."""
    ks = jax.random.split(key, 6)

    def lin(kw, kb, fan_in, fan_out):
        bound = 1.0 / jnp.sqrt(fan_in)
        w = jax.random.uniform(kw, (fan_in, fan_out), dtype, -bound, bound)
        b = jax.random.uniform(kb, (1, fan_out), dtype, -bound, bound)
        return w, b

    w1, b1 = lin(ks[0], ks[1], input_size, hidden)
    w2, b2 = lin(ks[2], ks[3], hidden, hidden)
    w3, b3 = lin(ks[4], ks[5], hidden, output_size)
    return (w1, b1, w2, b2, w3, b3)


def mlp_reference(params, x, g=None):
    if g is not None:
        x = jnp.concatenate([x, g], axis=-1)
    w1, b1, w2, b2, w3, b3 = params
    h = jnp.maximum(x @ w1 + b1, 0.0)
    h = jnp.maximum(h @ w2 + b2, 0.0)
    return h @ w3 + b3


if __name__ == "__main__":
    key = jax.random.PRNGKey(0)
    k_param, k_x, k_g, k_x2, k_g2 = jax.random.split(key, 5)

    # small shapes consistent with the module: batch=16, x=12 (+4 from g) -> input=16,
    # hidden=32, output=8
    batch, x_dim, g_dim, hidden, out_dim = 16, 12, 4, 32, 8
    input_size = x_dim + g_dim

    params = init_mlp_params(k_param, input_size, out_dim, hidden)
    params_nog = init_mlp_params(k_param, x_dim, out_dim, hidden)

    def check(p, xx, gg, **kw):
        ref = mlp_reference(p, xx, gg)
        # default path: bf16 matmul operands, f32 accumulation -> loose tolerance
        out_bf = jax.block_until_ready(mlp_forward(p, xx, gg, **kw))
        assert out_bf.shape == ref.shape
        assert jnp.allclose(out_bf, ref, atol=5e-2, rtol=5e-2), "bf16-matmul path mismatch"
        # exact f32 path -> tight tolerance
        out32 = jax.block_until_ready(mlp_forward(p, xx, gg, use_bf16_matmul=False, **kw))
        assert jnp.allclose(out32, ref, atol=1e-5, rtol=1e-5), "f32 path mismatch"

    x = jax.random.normal(k_x, (batch, x_dim), jnp.float32)
    g = jax.random.normal(k_g, (batch, g_dim), jnp.float32)
    check(params, x, g)                        # with g (split W1), single ragged grid step

    check(params_nog, x, None)                 # g=None, D_in=12 (non-multiple-of-8 features)

    batch3 = 300                               # non-tile-aligned batch
    x3 = jax.random.normal(k_x2, (batch3, x_dim), jnp.float32)
    g3 = jax.random.normal(k_g2, (batch3, g_dim), jnp.float32)
    check(params, x3, g3)                      # auto tile: 2 even grid steps, ragged last block
    check(params, x3, g3, batch_tile=128)      # forced small tile: 3 steps, masked final write

    print("KERNEL_OK")
</pallas_src>

<mosaic_0001>
module attributes {stable_mosaic.version = 11 : i64} {
  func.func @kernel(%arg0: i32, %arg1: memref<128x12xf32, #tpu.memory_space<vmem>>, %arg2: memref<128x4xf32, #tpu.memory_space<vmem>>, %arg3: memref<32x12xf32, #tpu.memory_space<vmem>>, %arg4: memref<32x4xf32, #tpu.memory_space<vmem>>, %arg5: memref<32x1xf32, #tpu.memory_space<vmem>>, %arg6: memref<32x32xf32, #tpu.memory_space<vmem>>, %arg7: memref<32x1xf32, #tpu.memory_space<vmem>>, %arg8: memref<8x32xf32, #tpu.memory_space<vmem>>, %arg9: memref<8x1xf32, #tpu.memory_space<vmem>>, %arg10: memref<8x128xf32, #tpu.memory_space<vmem>>) attributes {dimension_semantics = [#tpu.dimension_semantics<parallel>], iteration_bounds = array<i64: 1>, scalar_prefetch = 0 : i64, scratch_operands = 0 : i64, tpu.core_type = #tpu.core_type<tc>, window_params = [{transform_indices = @transform_0, window_bounds = array<i64: 128, 12>}, {transform_indices = @transform_1, window_bounds = array<i64: 128, 4>}, {pipeline_mode = #tpu.pipeline_mode<synchronous>, transform_indices = @transform_2, window_bounds = array<i64: 32, 12>}, {pipeline_mode = #tpu.pipeline_mode<synchronous>, transform_indices = @transform_3, window_bounds = array<i64: 32, 4>}, {pipeline_mode = #tpu.pipeline_mode<synchronous>, transform_indices = @transform_4, window_bounds = array<i64: 32, 1>}, {pipeline_mode = #tpu.pipeline_mode<synchronous>, transform_indices = @transform_5, window_bounds = array<i64: 32, 32>}, {pipeline_mode = #tpu.pipeline_mode<synchronous>, transform_indices = @transform_6, window_bounds = array<i64: 32, 1>}, {pipeline_mode = #tpu.pipeline_mode<synchronous>, transform_indices = @transform_7, window_bounds = array<i64: 8, 32>}, {pipeline_mode = #tpu.pipeline_mode<synchronous>, transform_indices = @transform_8, window_bounds = array<i64: 8, 1>}, {transform_indices = @transform_9, window_bounds = array<i64: 8, 128>}]} {
    %c0 = arith.constant 0 : index
    %c0_0 = arith.constant 0 : index
    %0 = vector.load %arg3[%c0, %c0_0] : memref<32x12xf32, #tpu.memory_space<vmem>>, vector<32x12xf32>
    %1 = arith.truncf %0 : vector<32x12xf32> to vector<32x12xbf16>
    %c0_1 = arith.constant 0 : index
    %c0_2 = arith.constant 0 : index
    %2 = vector.load %arg1[%c0_1, %c0_2] : memref<128x12xf32, #tpu.memory_space<vmem>>, vector<128x12xf32>
    %3 = arith.truncf %2 : vector<128x12xf32> to vector<128x12xbf16>
    %cst = arith.constant dense<0.000000e+00> : vector<32x128xf32>
    %4 = tpu.matmul %1, %3, %cst {dimension_numbers = #tpu.dot_dimension_numbers<[1], [1], [0], [0], [0, 0, 1, 0], [], []>} : vector<32x12xbf16>, vector<128x12xbf16>, vector<32x128xf32> -> vector<32x128xf32>
    %c0_3 = arith.constant 0 : index
    %c0_4 = arith.constant 0 : index
    %5 = vector.load %arg4[%c0_3, %c0_4] : memref<32x4xf32, #tpu.memory_space<vmem>>, vector<32x4xf32>
    %6 = arith.truncf %5 : vector<32x4xf32> to vector<32x4xbf16>
    %c0_5 = arith.constant 0 : index
    %c0_6 = arith.constant 0 : index
    %7 = vector.load %arg2[%c0_5, %c0_6] : memref<128x4xf32, #tpu.memory_space<vmem>>, vector<128x4xf32>
    %8 = arith.truncf %7 : vector<128x4xf32> to vector<128x4xbf16>
    %cst_7 = arith.constant dense<0.000000e+00> : vector<32x128xf32>
    %9 = tpu.matmul %6, %8, %cst_7 {dimension_numbers = #tpu.dot_dimension_numbers<[1], [1], [0], [0], [0, 0, 1, 0], [], []>} : vector<32x4xbf16>, vector<128x4xbf16>, vector<32x128xf32> -> vector<32x128xf32>
    %10 = arith.addf %4, %9 : vector<32x128xf32>
    %c0_8 = arith.constant 0 : index
    %c0_9 = arith.constant 0 : index
    %11 = vector.load %arg5[%c0_8, %c0_9] : memref<32x1xf32, #tpu.memory_space<vmem>>, vector<32x1xf32>
    %12 = vector.broadcast %11 : vector<32x1xf32> to vector<32x128xf32>
    %13 = arith.addf %10, %12 : vector<32x128xf32>
    %cst_10 = arith.constant 0.000000e+00 : f32
    %14 = vector.broadcast %cst_10 : f32 to vector<32x128xf32>
    %15 = arith.maximumf %13, %14 : vector<32x128xf32>
    %c0_11 = arith.constant 0 : index
    %c0_12 = arith.constant 0 : index
    %16 = vector.load %arg6[%c0_11, %c0_12] : memref<32x32xf32, #tpu.memory_space<vmem>>, vector<32x32xf32>
    %17 = arith.truncf %16 : vector<32x32xf32> to vector<32x32xbf16>
    %18 = arith.truncf %15 : vector<32x128xf32> to vector<32x128xbf16>
    %cst_13 = arith.constant dense<0.000000e+00> : vector<32x128xf32>
    %19 = tpu.matmul %17, %18, %cst_13 {dimension_numbers = #tpu.dot_dimension_numbers<[1], [0], [0], [1], [0, 0, 1, 1], [], []>} : vector<32x32xbf16>, vector<32x128xbf16>, vector<32x128xf32> -> vector<32x128xf32>
    %c0_14 = arith.constant 0 : index
    %c0_15 = arith.constant 0 : index
    %20 = vector.load %arg7[%c0_14, %c0_15] : memref<32x1xf32, #tpu.memory_space<vmem>>, vector<32x1xf32>
    %21 = vector.broadcast %20 : vector<32x1xf32> to vector<32x128xf32>
    %22 = arith.addf %19, %21 : vector<32x128xf32>
    %cst_16 = arith.constant 0.000000e+00 : f32
    %23 = vector.broadcast %cst_16 : f32 to vector<32x128xf32>
    %24 = arith.maximumf %22, %23 : vector<32x128xf32>
    %c0_17 = arith.constant 0 : index
    %c0_18 = arith.constant 0 : index
    %25 = vector.load %arg8[%c0_17, %c0_18] : memref<8x32xf32, #tpu.memory_space<vmem>>, vector<8x32xf32>
    %26 = arith.truncf %25 : vector<8x32xf32> to vector<8x32xbf16>
    %27 = arith.truncf %24 : vector<32x128xf32> to vector<32x128xbf16>
    %cst_19 = arith.constant dense<0.000000e+00> : vector<8x128xf32>
    %28 = tpu.matmul %26, %27, %cst_19 {dimension_numbers = #tpu.dot_dimension_numbers<[1], [0], [0], [1], [0, 0, 1, 1], [], []>} : vector<8x32xbf16>, vector<32x128xbf16>, vector<8x128xf32> -> vector<8x128xf32>
    %c0_20 = arith.constant 0 : index
    %c0_21 = arith.constant 0 : index
    %29 = vector.load %arg9[%c0_20, %c0_21] : memref<8x1xf32, #tpu.memory_space<vmem>>, vector<8x1xf32>
    %30 = vector.broadcast %29 : vector<8x1xf32> to vector<8x128xf32>
    %31 = arith.addf %28, %30 : vector<8x128xf32>
    %c0_22 = arith.constant 0 : index
    %c0_23 = arith.constant 0 : index
    %32 = vector.load %arg10[%c0_22, %c0_23] : memref<8x128xf32, #tpu.memory_space<vmem>>, vector<8x128xf32>
    tpu.vector_store %arg10[%c0_22, %c0_23], %31 {strides = array<i32>} : memref<8x128xf32, #tpu.memory_space<vmem>>, vector<8x128xf32>,
    return
  }
  func.func @transform_0(%arg0: i32) -> (i32, i32) {
    %c0_i32 = arith.constant 0 : i32
    %c0_i32_0 = arith.constant 0 : i32
    return %arg0, %c0_i32 : i32, i32
  }
  func.func @transform_1(%arg0: i32) -> (i32, i32) {
    %c0_i32 = arith.constant 0 : i32
    %c0_i32_0 = arith.constant 0 : i32
    return %arg0, %c0_i32 : i32, i32
  }
  func.func @transform_2(%arg0: i32) -> (i32, i32) {
    %c0_i32 = arith.constant 0 : i32
    %c0_i32_0 = arith.constant 0 : i32
    %c0_i32_1 = arith.constant 0 : i32
    return %c0_i32, %c0_i32_0 : i32, i32
  }
  func.func @transform_3(%arg0: i32) -> (i32, i32) {
    %c0_i32 = arith.constant 0 : i32
    %c0_i32_0 = arith.constant 0 : i32
    %c0_i32_1 = arith.constant 0 : i32
    return %c0_i32, %c0_i32_0 : i32, i32
  }
  func.func @transform_4(%arg0: i32) -> (i32, i32) {
    %c0_i32 = arith.constant 0 : i32
    %c0_i32_0 = arith.constant 0 : i32
    %c0_i32_1 = arith.constant 0 : i32
    return %c0_i32, %c0_i32_0 : i32, i32
  }
  func.func @transform_5(%arg0: i32) -> (i32, i32) {
    %c0_i32 = arith.constant 0 : i32
    %c0_i32_0 = arith.constant 0 : i32
    %c0_i32_1 = arith.constant 0 : i32
    return %c0_i32, %c0_i32_0 : i32, i32
  }
  func.func @transform_6(%arg0: i32) -> (i32, i32) {
    %c0_i32 = arith.constant 0 : i32
    %c0_i32_0 = arith.constant 0 : i32
    %c0_i32_1 = arith.constant 0 : i32
    return %c0_i32, %c0_i32_0 : i32, i32
  }
  func.func @transform_7(%arg0: i32) -> (i32, i32) {
    %c0_i32 = arith.constant 0 : i32
    %c0_i32_0 = arith.constant 0 : i32
    %c0_i32_1 = arith.constant 0 : i32
    return %c0_i32, %c0_i32_0 : i32, i32
  }
  func.func @transform_8(%arg0: i32) -> (i32, i32) {
    %c0_i32 = arith.constant 0 : i32
    %c0_i32_0 = arith.constant 0 : i32
    %c0_i32_1 = arith.constant 0 : i32
    return %c0_i32, %c0_i32_0 : i32, i32
  }
  func.func @transform_9(%arg0: i32) -> (i32, i32) {
    %c0_i32 = arith.constant 0 : i32
    %c0_i32_0 = arith.constant 0 : i32
    return %c0_i32, %arg0 : i32, i32
  }
}

</mosaic_0001>

<bundles_post_ra>
// kernel: tpu_custom_call.1
= control target key start
LH: loop header
LB: loop body
LE: loop exit
PB: predicated region body
PF: predicated region fallthrough
CT: control target
= control target key end

     0   :  { %vm94_vm0 = vcmask 31744   ;;  %vm144_vm1 = vcmask 97280   ;;  %s609_s0 = inlined_call_operand.vmem [shape: f32[16,12], index: 0, kind: input, shape index: {}]   ;;  %s610_s1 = inlined_call_operand.vmem [shape: f32[16,4], index: 1, kind: input, shape index: {}]   ;;  %s611_s2 = inlined_call_operand.vmem [shape: f32[32,12], index: 2, kind: input, shape index: {}]   ;;  %s612_s3 = inlined_call_operand.vmem [shape: f32[32,4], index: 3, kind: input, shape index: {}]   ;;  %s613_s4 = inlined_call_operand.vmem [shape: f32[32,1], index: 4, kind: input, shape index: {}]   ;;  %s614_s5 = inlined_call_operand.vmem [shape: f32[32,32], index: 5, kind: input, shape index: {}]   ;;  %s615_s6 = inlined_call_operand.vmem [shape: f32[32,1], index: 6, kind: input, shape index: {}]   ;;  %s616_s7 = inlined_call_operand.vmem [shape: f32[8,32], index: 7, kind: input, shape index: {}]   ;;  %s617_s8 = inlined_call_operand.vmem [shape: f32[8,1], index: 8, kind: input, shape index: {}]   ;;  %s618_s9 = inlined_call_operand.hbm [shape: f32[8,16], index: 9, kind: output, shape index: {}]  }
   0x1   :  { %v84_v0 = vld [vmem:[%s610_s1 + $0x70] sm:$0xff]  ;;  %v85_v1 = vld [vmem:[%s610_s1 + $0x78] sm:$0xff]  ;;  %v82_v6 = vld [vmem:[%s610_s1 + $0x60] sm:$0xff] }
   0x2   :  { %v54_v2 = vld [vmem:[%s609_s0 + $0x70] sm:$0xff]  ;;  %v93_v3 = vpack.c.bf16 %v85_v1, %v84_v0  ;;  %v55_v4 = vld [vmem:[%s609_s0 + $0x78] sm:$0xff]  ;;  %v83_v7 = vld [vmem:[%s610_s1 + $0x68] sm:$0xff] }
   0x3   :  { %v63_v5 = vpack.c.bf16 %v55_v4, %v54_v2  ;;  %v52_v9 = vld [vmem:[%s609_s0 + $0x60] sm:$0xff]  ;;  %v53_v10 = vld [vmem:[%s609_s0 + $0x68] sm:$0xff]  ;;  %v92_v12 = vpack.c.bf16 %v83_v7, %v82_v6 }
   0x4   :  { %v123_v8 = vsel %vm94_vm0, %v93_v3, 0  ;;  %v62_v13 = vpack.c.bf16 %v53_v10, %v52_v9 }
   0x5   :  { %125 = vmatpush.bf16.xpose.msra.mxu0 %v123_v8  ;;  %v173_v11 = vsel %vm144_vm1, %v63_v5, 0 }
   0x6   :  { %175 = vmatpush.bf16.xpose.msra.mxu1 %v173_v11 }
   0x7   :  { %14 = vsyncpa [#allocation3], 0  ;;  %v120_v14 = vsel %vm94_vm0, %v92_v12, 0  ;;  %v170_v15 = vsel %vm144_vm1, %v62_v13, 0  ;;  %v80_v16 = vld [vmem:[%s610_s1 + $0x50] sm:$0xff]  ;;  %v81_v17 = vld [vmem:[%s610_s1 + $0x58] sm:$0xff] }
   0x8   :  { %v50_v18 = vld [vmem:[%s609_s0 + $0x50] sm:$0xff]  ;;  %v51_v19 = vld [vmem:[%s609_s0 + $0x58] sm:$0xff]  ;;  %v91_v20 = vpack.c.bf16 %v81_v17, %v80_v16  ;;  %v78_v24 = vld [vmem:[%s610_s1 + $0x40] sm:$0xff]  ;;  %v369_v47 = vmov 0   ;;  %vm258_vm2 = vcmask 261120   ;;  %s370_s22 = smov [#allocation2]  }
   0x9   :  { %v61_v21 = vpack.c.bf16 %v51_v19, %v50_v18  ;;  %v79_v25 = vld [vmem:[%s610_s1 + $0x48] sm:$0xff]  ;;  %v48_v26 = vld [vmem:[%s609_s0 + $0x40] sm:$0xff]  ;;  %v76_v32 = vld [vmem:[%s610_s1 + $0x30] sm:$0xff]  ;;  %341 = vset.pattern.permute.xlu1 %v369_v47  ;;  %340 = vset.pattern.permute.xlu0 %v369_v47  ;;  %s320_s23 = sshll.u32 %s370_s22, 4  ;;  %s322_s26 = sshll.u32 %s618_s9, 4  ;;  %s321_s23 = int_to_ptr.vmem [resolvable:$true] %s320_s23  ;;  %s323_s26 = int_to_ptr.hbm [resolvable:$true] %s322_s26 }
   0xa   :  { %v117_v22 = vsel %vm94_vm0, %v91_v20, 0  ;;  %v49_v27 = vld [vmem:[%s609_s0 + $0x48] sm:$0xff]  ;;  %v90_v28 = vpack.c.bf16 %v79_v25, %v78_v24  ;;  %v77_v33 = vld [vmem:[%s610_s1 + $0x38] sm:$0xff]  ;;  %v46_v34 = vld [vmem:[%s609_s0 + $0x30] sm:$0xff]  ;;  %342 = vset.pattern.permute.xlu2 %v369_v47 }
   0xb   :  { %v167_v23 = vsel %vm144_vm1, %v61_v21, 0  ;;  %v60_v29 = vpack.c.bf16 %v49_v27, %v48_v26  ;;  %v47_v35 = vld [vmem:[%s609_s0 + $0x38] sm:$0xff]  ;;  %v89_v36 = vpack.c.bf16 %v77_v33, %v76_v32  ;;  %v74_v40 = vld [vmem:[%s610_s1 + $0x20] sm:$0xff]  ;;  %v75_v41 = vld [vmem:[%s610_s1 + $0x28] sm:$0xff] }
   0xc   :  { %v114_v30 = vsel %vm94_vm0, %v90_v28, 0  ;;  %v59_v37 = vpack.c.bf16 %v47_v35, %v46_v34  ;;  %v44_v42 = vld [vmem:[%s609_s0 + $0x20] sm:$0xff]  ;;  %v45_v43 = vld [vmem:[%s609_s0 + $0x28] sm:$0xff]  ;;  %v196_v44 = vld [vmem:[%s613_s4 + $0x10] sm:$0xff]  ;;  %v88_v46 = vpack.c.bf16 %v75_v41, %v74_v40 }
   0xd   :  { %126 = vmatpush.bf16.xpose.msra.mxu0 %v120_v14  ;;  %v164_v31 = vsel %vm144_vm1, %v60_v29, 0  ;;  %v111_v38 = vsel %vm94_vm0, %v89_v36, 0  ;;  %v194_v45 = vld [vmem:[%s613_s4] sm:$0xff]  ;;  %v58_v48 = vpack.c.bf16 %v45_v43, %v44_v42  ;;  %210 = vperm.xlu0 %340, %v196_v44   ;;  %v72_v51 = vld [vmem:[%s610_s1 + $0x10] sm:$0xff]  ;;  %v73_v52 = vld [vmem:[%s610_s1 + $0x18] sm:$0xff] }
   0xe   :  { %176 = vmatpush.bf16.xpose.msra.mxu1 %v170_v15  ;;  %v161_v39 = vsel %vm144_vm1, %v59_v37, 0  ;;  %200 = vperm.xlu1 %341, %v194_v45   ;;  %v108_v49 = vsel %vm94_vm0, %v88_v46, 0  ;;  %v42_v53 = vld [vmem:[%s609_s0 + $0x10] sm:$0xff]  ;;  %v43_v54 = vld [vmem:[%s609_s0 + $0x18] sm:$0xff]  ;;  %v87_v55 = vpack.c.bf16 %v73_v52, %v72_v51  ;;  %v70_v59 = vld [vmem:[%s610_s1] sm:$0xff] }
   0xf   :  { %v158_v50 = vsel %vm144_vm1, %v58_v48, 0  ;;  %v57_v56 = vpack.c.bf16 %v43_v54, %v42_v53  ;;  %v71_v60 = vld [vmem:[%s610_s1 + $0x8] sm:$0xff]  ;;  %v40_v61 = vld [vmem:[%s609_s0] sm:$0xff]  ;;  %v197_v63 = vld [vmem:[%s613_s4 + $0x18] sm:$0xff] }
  0x10   :  { %v105_v57 = vsel %vm94_vm0, %v87_v55, 0  ;;  %v41_v62 = vld [vmem:[%s609_s0 + $0x8] sm:$0xff]  ;;  %v86_v1 = vpack.c.bf16 %v71_v60, %v70_v59  ;;  %v234_v5 = vld [vmem:[%s615_s6] sm:$0xff]  ;;  %v66_v13 = vld [vmem:[%s612_s3 + $0x10] sm:$0xff] }
  0x11   :  { %v155_v58 = vsel %vm144_vm1, %v57_v56, 0  ;;  %v195_v0 = vld [vmem:[%s613_s4 + $0x8] sm:$0xff]  ;;  %v56_v2 = vpack.c.bf16 %v41_v62, %v40_v61  ;;  %v64_v7 = vld [vmem:[%s612_s3] sm:$0xff]  ;;  %v67_v14 = vld [vmem:[%s612_s3 + $0x18] sm:$0xff] }
  0x12   :  { %v102_v3 = vsel %vm94_vm0, %v86_v1, 0  ;;  %v235_v6 = vld [vmem:[%s615_s6 + $0x8] sm:$0xff]  ;;  %v34_v9 = vld [vmem:[%s611_s2] sm:$0xff]  ;;  %v36_v15 = vld [vmem:[%s611_s2 + $0x10] sm:$0xff]  ;;  %v69_v17 = vpack.c.bf16 %v67_v14, %v66_v13 }
  0x13   :  { %v152_v4 = vsel %vm144_vm1, %v56_v2, 0  ;;  %v65_v8 = vld [vmem:[%s612_s3 + $0x8] sm:$0xff]  ;;  %v37_v16 = vld [vmem:[%s611_s2 + $0x18] sm:$0xff]  ;;  %v236_v32 = vld [vmem:[%s615_s6 + $0x10] sm:$0xff] }
  0x14   :  { %v35_v10 = vld [vmem:[%s611_s2 + $0x8] sm:$0xff]  ;;  %v68_v11 = vpack.c.bf16 %v65_v8, %v64_v7  ;;  %v39_v18 = vpack.c.bf16 %v37_v16, %v36_v15  ;;  %250 = vperm.xlu2 %342, %v236_v32   ;;  %v237_v42 = vld [vmem:[%s615_s6 + $0x18] sm:$0xff]  ;;  %v226_v46 = vld [vmem:[%s614_s5] sm:$0xff] }
  0x15   :  { %127 = vmatpush.bf16.xpose.msra.mxu0 %v117_v22  ;;  %215 = vperm.xlu0 %340, %v197_v63   ;;  %v38_v12 = vpack.c.bf16 %v35_v10, %v34_v9  ;;  %v227_v47 = vld [vmem:[%s614_s5 + $0x8] sm:$0xff]  ;;  %v228_v51 = vld [vmem:[%s614_s5 + $0x10] sm:$0xff]  ;;  %v229_v52 = vld [vmem:[%s614_s5 + $0x18] sm:$0xff] }
  0x16   :  { %177 = vmatpush.bf16.xpose.msra.mxu1 %v167_v23  ;;  %205 = vperm.xlu1 %341, %v195_v0   ;;  %v231_v53 = vpack.c.bf16 %v229_v52, %v228_v51  ;;  %v288_v7 = vld [vmem:[%s616_s7] sm:$0xff] }
  0x17   :  { %v289_v9 = vpack.c.bf16 %v288_v7, %v288_v7 }
  0x1c   :  { %255 = vperm.xlu2 %342, %v237_v42  }
  0x1d   :  { %128 = vmatpush.bf16.xpose.msra.mxu0 %v114_v30  ;;  %240 = vperm.xlu0 %340, %v234_v5  }
  0x1e   :  { %178 = vmatpush.bf16.xpose.msra.mxu1 %v164_v31  ;;  %245 = vperm.xlu1 %341, %v235_v6  }
  0x25   :  { %129 = vmatpush.bf16.xpose.msra.mxu0 %v111_v38 }
  0x26   :  { %179 = vmatpush.bf16.xpose.msra.mxu1 %v161_v39 }
  0x2d   :  { %130 = vmatpush.bf16.xpose.msra.mxu0 %v108_v49  ;;  %v230_v49 = vpack.c.bf16 %v227_v47, %v226_v46 }
  0x2e   :  { %180 = vmatpush.bf16.xpose.msra.mxu1 %v158_v50  ;;  %v292_v50 = vld [vmem:[%s617_s8] sm:$0xff] }
  0x2f   :  { %295 = vperm.xlu2 %342, %v292_v50  }
  0x35   :  { %131 = vmatpush.bf16.xpose.msra.mxu0 %v105_v57 }
  0x36   :  { %181 = vmatpush.bf16.xpose.msra.mxu1 %v155_v58 }
  0x3d   :  { %132 = vmatpush.bf16.xpose.msra.mxu0 %v102_v3 }
  0x3e   :  { %182 = vmatpush.bf16.xpose.msra.mxu1 %v152_v4 }
  0x44   :  { %331 = vmatmul.msk.bf16.vlgmr.msra.gmra.mxu0 %vm94_vm0, %v68_v11 }
  0x45   :  { %333 = vmatmul.msk.bf16.vlgmr.msra.gmra.mxu1 %vm144_vm1, %v38_v12 }
  0x54   :  { %332 = vmatmul.msk.bf16.gmra.mxu0 %vm94_vm0, %v69_v17 }
  0x55   :  { %334 = vmatmul.msk.bf16.gmra.mxu1 %vm144_vm1, %v39_v18 }
  0x6e   :  { %v251_v56 = vpop.permute.xlu2 %250 }
  0x76   :  { %v256_v60 = vpop.permute.xlu2 %255 }
  0x7f   :  { %v211_v25 = vpop.permute.xlu0 %210 }
  0x80   :  { %v201_v23 = vpop.permute.xlu1 %200 }
  0x87   :  { %v216_v36 = vpop.permute.xlu0 %215 }
  0x88   :  { %v206_v30 = vpop.permute.xlu1 %205 }
  0x89   :  { %v296_v10 = vpop.permute.xlu2 %295 }
  0x8f   :  { %v241_v0 = vpop.permute.xlu0 %240 }
  0x90   :  { %v246_v58 = vpop.permute.xlu1 %245 }
  0xc1   :  { %v134_v19 = vpop.f32.mrf.mxu0 }
  0xc2   :  { %v184_v20 = vpop.f32.mrf.mxu1 }
  0xc3   :  { %v185_v33 = vadd.f32 %v184_v20, %v134_v19 }
  0xc5   :  { %v218_v39 = vadd.f32 %v201_v23, %v185_v33 }
  0xc7   :  { %v222_v45 = vmax.f32 %v218_v39, 0.0 }
  0xc9   :  { %v136_v21 = vpop.f32.mrf.mxu0 }
  0xca   :  { %v186_v22 = vpop.f32.mrf.mxu1 }
  0xcb   :  { %v187_v28 = vadd.f32 %v186_v22, %v136_v21 }
  0xcd   :  { %v219_v37 = vadd.f32 %v206_v30, %v187_v28 }
  0xcf   :  { %v223_v43 = vmax.f32 %v219_v37, 0.0 }
  0xd1   :  { %v139_v24 = vpop.f32.mrf.mxu0  ;;  %v232_v48 = vpack.c.bf16 %v223_v43, %v222_v45 }
  0xd2   :  { %v189_v26 = vpop.f32.mrf.mxu1 }
  0xd3   :  { %v190_v27 = vadd.f32 %v189_v26, %v139_v24 }
  0xd5   :  { %v220_v35 = vadd.f32 %v211_v25, %v190_v27 }
  0xd7   :  { %v224_v40 = vmax.f32 %v220_v35, 0.0 }
  0xd9   :  { %v141_v29 = vpop.f32.mrf.mxu0 }
  0xda   :  { %v191_v31 = vpop.f32.mrf.mxu1 }
  0xdb   :  { %v192_v34 = vadd.f32 %v191_v31, %v141_v29 }
  0xdd   :  { %v221_v38 = vadd.f32 %v216_v36, %v192_v34 }
  0xdf   :  { %v225_v41 = vmax.f32 %v221_v38, 0.0 }
  0xe1   :  { %v233_v44 = vpack.c.bf16 %v225_v41, %v224_v40 }
  0xe3   :  { %271 = vmatpush.bf16.msra.mxu2 %v233_v44 }
  0xe7   :  { %272 = vmatpush.bf16.msra.mxu2 %v232_v48 }
  0xea   :  { %335 = vmatmul.msk.bf16.vlgmr.msra.gmra.mxu2 %vm258_vm2, %v230_v49 }
  0xfa   :  { %336 = vmatmul.msk.bf16.gmra.mxu2 %vm258_vm2, %v231_v53 }
 0x16d   :  { %v274_v54 = vpop.f32.mrf.mxu2 }
 0x16e   :  { %v275_v1 = vadd.f32 %v274_v54, %v241_v0 }
 0x170   :  { %v284_v6 = vmax.f32 %v275_v1, 0.0 }
 0x175   :  { %v276_v55 = vpop.f32.mrf.mxu2 }
 0x176   :  { %v277_v62 = vadd.f32 %v276_v55, %v246_v58 }
 0x178   :  { %v285_v4 = vmax.f32 %v277_v62, 0.0 }
 0x17a   :  { %v290_v8 = vpack.c.bf16 %v285_v4, %v284_v6 }
 0x17d   :  { %v279_v57 = vpop.f32.mrf.mxu2 }
 0x17e   :  { %v280_v59 = vadd.f32 %v279_v57, %v251_v56 }
 0x180   :  { %v286_v2 = vmax.f32 %v280_v59, 0.0 }
 0x185   :  { %v281_v61 = vpop.f32.mrf.mxu2 }
 0x186   :  { %v282_v63 = vadd.f32 %v281_v61, %v256_v60 }
 0x188   :  { %v287_v3 = vmax.f32 %v282_v63, 0.0 }
 0x18a   :  { %v291_v5 = vpack.c.bf16 %v287_v3, %v286_v2 }
 0x18c   :  { %307 = vmatpush.bf16.msra.mxu3 %v291_v5 }
 0x190   :  { %308 = vmatpush.bf16.msra.mxu3 %v290_v8 }
 0x193   :  { %337 = vmatmul.msk.bf16.vlgmr.msra.gmra.mxu3 %vm258_vm2, %v289_v9 }
 0x216   :  { %v310_v11 = vpop.f32.mrf.mxu3 }
 0x217   :  { %v311_v12 = vadd.f32 %v310_v11, %v296_v10 }
 0x219   :  { %314 = vst [vmem:[#allocation2] sm:$0xff] %v311_v12 }
 0x21a   :  { %325 = dma.vmem_to_hbm [thread:$0]  %s321_s23, 128, %s323_s26, [#allocation3]  }
 0x21e   :  { %v312_v13 = vpop.f32.mrf.mxu3 }
 0x21f   :  { %367 = dma.done.wait [#allocation3], 128  }
 0x220   :  { %368 = vsyncadd [#allocation3], 4294967168 }
 0x221   :  { %330 = vsyncpa [#allocation3], 1 }

</bundles_post_ra>
